<compile_context>
chip_gen: v6e
topology: v6e:2x2x1
jax: 0.10.0
libtpu: 0.0.40
codegen_flags: <defaults>
</compile_context>

<pallas_src>
import jax
import jax.numpy as jnp
from jax.experimental import pallas as pl
from jax.experimental.pallas import tpu as pltpu


NEG_BIG = -1e30  # f32-only padded-action bias (never cast to bf16)


def _round_up(x, m):
    return ((x + m - 1) // m) * m


def _policy_kernel(xT_ref, w1T_ref, b1_ref, w2T_ref, b2_ref, o_ref):
    # fc1^T: (H, S_pad)bf16 @ (S_pad, TB)bf16 -> (H, TB) f32 accumulate.
    h = jnp.dot(w1T_ref[...], xT_ref[...], preferred_element_type=jnp.float32)
    h = jnp.maximum(h + b1_ref[...], 0.0)          # bias + relu in f32

    # fc2^T: (A_pad, H)bf16 @ (H, TB)bf16 -> (A_pad, TB) f32 accumulate.
    logits = jnp.dot(w2T_ref[...], h.astype(jnp.bfloat16),
                     preferred_element_type=jnp.float32)
    logits = logits + b2_ref[...]                  # padded rows carry -1e30 (f32)

    # Numerically-stable softmax over the (8-sublane) action axis.
    # Padded action rows give exp(-huge) == 0 exactly.
    m = jnp.max(logits, axis=0, keepdims=True)     # (1, TB)
    e = jnp.exp(logits - m)                        # (A_pad, TB)
    denom = jnp.sum(e, axis=0, keepdims=True)      # (1, TB)
    inv = 1.0 / denom                              # exact; only (1, TB) work
    o_ref[...] = (e * inv).astype(o_ref.dtype)


def _choose_tile(batch, block_b):
    """Batch tile on the lane axis: multiple of 128, <= block_b, and (when the
    batch allows it) small enough to give >= 2 grid steps for v7x's 2 TCs."""
    block_b = max(128, _round_up(block_b, 128))
    if batch <= 128:
        return 128
    half = _round_up((batch + 1) // 2, 128)
    return max(128, min(block_b, half))


def policy_forward(x, w1, b1, w2, b2, *, block_b=8192):
    """x: (B, state_size) f32 -> action probabilities (B, action_size) f32.

    w1: (S, H), b1: (1, H), w2: (H, A), b2: (1, A)  (x @ W + b convention).
    Internally runs with batch on the lane axis (transposed layout).
    """
    B, S = x.shape
    H = w1.shape[1]
    A = w2.shape[1]

    s_pad = _round_up(S, 8)          # state dim -> 8 sublanes (zero padded)
    a_pad = _round_up(A, 8)          # action dim -> 8 sublanes (zero W, -1e30 bias)

    tb = _choose_tile(B, block_b)
    b_pad = _round_up(B, tb)

    # ---- transposed, padded operands (batch on the lane axis) ---------------
    xT = jnp.zeros((s_pad, b_pad), jnp.bfloat16).at[:S, :B].set(
        x.T.astype(jnp.bfloat16))
    w1T = jnp.zeros((H, s_pad), jnp.bfloat16).at[:, :S].set(
        w1.T.astype(jnp.bfloat16))
    b1T = b1.reshape(H, 1).astype(jnp.float32)
    w2T = jnp.zeros((a_pad, H), jnp.bfloat16).at[:A, :].set(
        w2.T.astype(jnp.bfloat16))
    b2T = jnp.full((a_pad, 1), NEG_BIG, jnp.float32).at[:A, :].set(
        b2.reshape(A, 1).astype(jnp.float32))

    grid = (b_pad // tb,)
    out = pl.pallas_call(
        _policy_kernel,
        out_shape=jax.ShapeDtypeStruct((a_pad, b_pad), jnp.float32),
        grid_spec=pltpu.PrefetchScalarGridSpec(
            num_scalar_prefetch=0,
            grid=grid,
            in_specs=[
                pl.BlockSpec((s_pad, tb), lambda i: (0, i)),   # x^T: tiled over batch lanes
                pl.BlockSpec((H, s_pad), lambda i: (0, 0)),    # w1^T: resident
                pl.BlockSpec((H, 1), lambda i: (0, 0)),        # b1:   resident
                pl.BlockSpec((a_pad, H), lambda i: (0, 0)),    # w2^T (padded): resident
                pl.BlockSpec((a_pad, 1), lambda i: (0, 0)),    # b2   (padded): resident
            ],
            out_specs=pl.BlockSpec((a_pad, tb), lambda i: (0, i)),
        ),
        compiler_params=pltpu.CompilerParams(
            # Batch tiles are independent -> shard across TensorCores on v7x.
            dimension_semantics=("parallel",),
        ),
    )(xT, w1T, b1T, w2T, b2T)

    # Small slice + transpose of the (8, b_pad) slab back to the (B, A) interface.
    return out[:A, :B].T


def init_params(key, state_size, hidden, action_size):
    """Deterministic synthetic init mimicking nn.Linear's uniform(-1/sqrt(fan_in), ...)."""
    k1, k2, k3, k4 = jax.random.split(key, 4)
    bound1 = 1.0 / jnp.sqrt(jnp.float32(state_size))
    bound2 = 1.0 / jnp.sqrt(jnp.float32(hidden))
    w1 = jax.random.uniform(k1, (state_size, hidden), jnp.float32, -bound1, bound1)
    b1 = jax.random.uniform(k2, (1, hidden), jnp.float32, -bound1, bound1)
    w2 = jax.random.uniform(k3, (hidden, action_size), jnp.float32, -bound2, bound2)
    b2 = jax.random.uniform(k4, (1, action_size), jnp.float32, -bound2, bound2)
    return w1, b1, w2, b2


if __name__ == "__main__":
    STATE_SIZE = 4     # CartPole-v1 observation dim
    ACTION_SIZE = 2    # CartPole-v1 action dim
    HIDDEN = 128
    BATCH = 256        # many states per call (amortizes launch + weight DMA)
    BLOCK_B = 128      # small tile here so grid=(2,) exercises weight residency

    key = jax.random.PRNGKey(0)
    kx, kp = jax.random.split(key)
    x = jax.random.normal(kx, (BATCH, STATE_SIZE), dtype=jnp.float32)
    w1, b1, w2, b2 = init_params(kp, STATE_SIZE, HIDDEN, ACTION_SIZE)

    probs = policy_forward(x, w1, b1, w2, b2, block_b=BLOCK_B)
    probs = jax.block_until_ready(probs)
    assert probs.shape == (BATCH, ACTION_SIZE)

    # Reference in plain JAX using the same bf16-quantized MXU inputs
    # (kernel accumulates in f32; h is re-quantized to bf16 before fc2).
    xq = x.astype(jnp.bfloat16).astype(jnp.float32)
    w1q = w1.astype(jnp.bfloat16).astype(jnp.float32)
    w2q = w2.astype(jnp.bfloat16).astype(jnp.float32)
    h_ref = jnp.maximum(xq @ w1q + b1, 0.0)
    ref = jax.nn.softmax(h_ref @ w2q + b2, axis=-1)

    assert jnp.allclose(probs, ref, atol=1e-2, rtol=1e-2), "mismatch vs reference"
    assert jnp.allclose(jnp.sum(probs, axis=-1), 1.0, atol=1e-3), "rows must sum to ~1"
    assert bool(jnp.all(probs >= 0.0)), "probabilities must be non-negative"

    print("KERNEL_OK")
</pallas_src>

<mosaic_0001>
module attributes {stable_mosaic.version = 11 : i64} {
  func.func @_policy_kernel(%arg0: i32, %arg1: memref<8x128xbf16, #tpu.memory_space<vmem>>, %arg2: memref<128x8xbf16, #tpu.memory_space<vmem>>, %arg3: memref<128x1xf32, #tpu.memory_space<vmem>>, %arg4: memref<8x128xbf16, #tpu.memory_space<vmem>>, %arg5: memref<8x1xf32, #tpu.memory_space<vmem>>, %arg6: memref<8x128xf32, #tpu.memory_space<vmem>>) attributes {dimension_semantics = [#tpu.dimension_semantics<parallel>], iteration_bounds = array<i64: 2>, scalar_prefetch = 0 : i64, scratch_operands = 0 : i64, tpu.core_type = #tpu.core_type<tc>, window_params = [{transform_indices = @transform_0, window_bounds = array<i64: 8, 128>}, {pipeline_mode = #tpu.pipeline_mode<synchronous>, transform_indices = @transform_1, window_bounds = array<i64: 128, 8>}, {pipeline_mode = #tpu.pipeline_mode<synchronous>, transform_indices = @transform_2, window_bounds = array<i64: 128, 1>}, {pipeline_mode = #tpu.pipeline_mode<synchronous>, transform_indices = @transform_3, window_bounds = array<i64: 8, 128>}, {pipeline_mode = #tpu.pipeline_mode<synchronous>, transform_indices = @transform_4, window_bounds = array<i64: 8, 1>}, {transform_indices = @transform_5, window_bounds = array<i64: 8, 128>}]} {
    %c0 = arith.constant 0 : index
    %c0_0 = arith.constant 0 : index
    %0 = vector.load %arg2[%c0, %c0_0] : memref<128x8xbf16, #tpu.memory_space<vmem>>, vector<128x8xbf16>
    %c0_1 = arith.constant 0 : index
    %c0_2 = arith.constant 0 : index
    %1 = vector.load %arg1[%c0_1, %c0_2] : memref<8x128xbf16, #tpu.memory_space<vmem>>, vector<8x128xbf16>
    %cst = arith.constant dense<0.000000e+00> : vector<128x128xf32>
    %2 = tpu.matmul %0, %1, %cst {dimension_numbers = #tpu.dot_dimension_numbers<[1], [0], [0], [1], [0, 0, 1, 1], [], []>} : vector<128x8xbf16>, vector<8x128xbf16>, vector<128x128xf32> -> vector<128x128xf32>
    %c0_3 = arith.constant 0 : index
    %c0_4 = arith.constant 0 : index
    %3 = vector.load %arg3[%c0_3, %c0_4] : memref<128x1xf32, #tpu.memory_space<vmem>>, vector<128x1xf32>
    %4 = vector.broadcast %3 : vector<128x1xf32> to vector<128x128xf32>
    %5 = arith.addf %2, %4 : vector<128x128xf32>
    %cst_5 = arith.constant 0.000000e+00 : f32
    %6 = vector.broadcast %cst_5 : f32 to vector<128x128xf32>
    %7 = arith.maximumf %5, %6 : vector<128x128xf32>
    %c0_6 = arith.constant 0 : index
    %c0_7 = arith.constant 0 : index
    %8 = vector.load %arg4[%c0_6, %c0_7] : memref<8x128xbf16, #tpu.memory_space<vmem>>, vector<8x128xbf16>
    %9 = arith.truncf %7 : vector<128x128xf32> to vector<128x128xbf16>
    %cst_8 = arith.constant dense<0.000000e+00> : vector<8x128xf32>
    %10 = tpu.matmul %8, %9, %cst_8 {dimension_numbers = #tpu.dot_dimension_numbers<[1], [0], [0], [1], [0, 0, 1, 1], [], []>} : vector<8x128xbf16>, vector<128x128xbf16>, vector<8x128xf32> -> vector<8x128xf32>
    %c0_9 = arith.constant 0 : index
    %c0_10 = arith.constant 0 : index
    %11 = vector.load %arg5[%c0_9, %c0_10] : memref<8x1xf32, #tpu.memory_space<vmem>>, vector<8x1xf32>
    %12 = vector.broadcast %11 : vector<8x1xf32> to vector<8x128xf32>
    %13 = arith.addf %10, %12 : vector<8x128xf32>
    %cst_11 = arith.constant dense<0xFF800000> : vector<128xf32>
    %14 = vector.multi_reduction <maximumf>, %13, %cst_11 [0] : vector<8x128xf32> to vector<128xf32>
    %15 = vector.shape_cast %14 : vector<128xf32> to vector<1x128xf32>
    %16 = vector.broadcast %15 : vector<1x128xf32> to vector<8x128xf32>
    %17 = arith.subf %13, %16 : vector<8x128xf32>
    %18 = math.exp %17 : vector<8x128xf32>
    %cst_12 = arith.constant dense<0.000000e+00> : vector<128xf32>
    %19 = vector.multi_reduction <add>, %18, %cst_12 [0] : vector<8x128xf32> to vector<128xf32>
    %20 = vector.shape_cast %19 : vector<128xf32> to vector<1x128xf32>
    %cst_13 = arith.constant 1.000000e+00 : f32
    %21 = vector.broadcast %cst_13 : f32 to vector<1x128xf32>
    %22 = arith.divf %21, %20 : vector<1x128xf32>
    %23 = vector.broadcast %22 : vector<1x128xf32> to vector<8x128xf32>
    %24 = arith.mulf %18, %23 : vector<8x128xf32>
    %c0_14 = arith.constant 0 : index
    %c0_15 = arith.constant 0 : index
    %25 = vector.load %arg6[%c0_14, %c0_15] : memref<8x128xf32, #tpu.memory_space<vmem>>, vector<8x128xf32>
    tpu.vector_store %arg6[%c0_14, %c0_15], %24 {strides = array<i32>} : memref<8x128xf32, #tpu.memory_space<vmem>>, vector<8x128xf32>,
    return
  }
  func.func @transform_0(%arg0: i32) -> (i32, i32) {
    %c0_i32 = arith.constant 0 : i32
    %c0_i32_0 = arith.constant 0 : i32
    return %c0_i32, %arg0 : i32, i32
  }
  func.func @transform_1(%arg0: i32) -> (i32, i32) {
    %c0_i32 = arith.constant 0 : i32
    %c0_i32_0 = arith.constant 0 : i32
    %c0_i32_1 = arith.constant 0 : i32
    return %c0_i32, %c0_i32_0 : i32, i32
  }
  func.func @transform_2(%arg0: i32) -> (i32, i32) {
    %c0_i32 = arith.constant 0 : i32
    %c0_i32_0 = arith.constant 0 : i32
    %c0_i32_1 = arith.constant 0 : i32
    return %c0_i32, %c0_i32_0 : i32, i32
  }
  func.func @transform_3(%arg0: i32) -> (i32, i32) {
    %c0_i32 = arith.constant 0 : i32
    %c0_i32_0 = arith.constant 0 : i32
    %c0_i32_1 = arith.constant 0 : i32
    return %c0_i32, %c0_i32_0 : i32, i32
  }
  func.func @transform_4(%arg0: i32) -> (i32, i32) {
    %c0_i32 = arith.constant 0 : i32
    %c0_i32_0 = arith.constant 0 : i32
    %c0_i32_1 = arith.constant 0 : i32
    return %c0_i32, %c0_i32_0 : i32, i32
  }
  func.func @transform_5(%arg0: i32) -> (i32, i32) {
    %c0_i32 = arith.constant 0 : i32
    %c0_i32_0 = arith.constant 0 : i32
    return %c0_i32, %arg0 : i32, i32
  }
}

</mosaic_0001>

<bundles_post_ra>
// kernel: tpu_custom_call.1
= control target key start
LH: loop header
LB: loop body
LE: loop exit
PB: predicated region body
PF: predicated region fallthrough
CT: control target
= control target key end

     0   :  { %10 = vsyncpa [#allocation3], 0  ;;  %s1089_s0 = inlined_call_operand.vmem [shape: bf16[8,256], index: 0, kind: input, shape index: {}]   ;;  %s1090_s1 = inlined_call_operand.vmem [shape: bf16[128,8], index: 1, kind: input, shape index: {}]   ;;  %s1091_s2 = inlined_call_operand.vmem [shape: f32[128,1], index: 2, kind: input, shape index: {}]   ;;  %s1092_s3 = inlined_call_operand.vmem [shape: bf16[8,128], index: 3, kind: input, shape index: {}]   ;;  %s1093_s4 = inlined_call_operand.vmem [shape: f32[8,1], index: 4, kind: input, shape index: {}]   ;;  %s1094_s5 = inlined_call_operand.hbm [shape: f32[8,256], index: 5, kind: output, shape index: {}]  }
   0x1   :  { %12 = vsyncpa [#allocation3 + $0x1], 0  ;;  %s898_s18 = smov 0   ;;  %s900_s19 = smov 0  }
   0x2   :  { %s902_s20 = smov 0   ;;  %s904_s21 = smov 0  }
   0x3 LB: > { %s919_s22 = sadd.s32 4294967295, %s862_s21   ;;  %s663_s23 = sadd.s32 4294967294, %s862_s21   ;;  %s862_s21 = sphi %s904_s21, %s1100_s21   ;;  %s858_s20 = sphi %s902_s20, %s1099_s20   ;;  %s854_s19 = sphi %s900_s19, %s1098_s19   ;;  %s850_s18 = sphi %s898_s18, %s1097_s18  }
   0x4   : > { %s923_s24 = sadd.s32 1, %s862_s21   ;;  %s135_s25 = sadd.s32 1, %s858_s20 }
   0x5   : > { %s132_s26 = ssub.s32 %s862_s21, %s923_s24  ;;  %p145_p0 = scmp.ne.s32.totalorder %s858_s20, %s854_s19 }
   0x6   : > { %p133_p1 = scmp.eq.s32.totalorder %s132_s26, 0  ;;  %p146_p2 = scmp.eq.s32.totalorder %s919_s22, 1 }
   0x7   : > { %p151_p3 = scmp.ne.s32.totalorder %s854_s19, %s850_s18  ;;  %p152_p4 = scmp.eq.s32.totalorder %s663_s23, 1 }
   0x8   : > { %s934_s27 = scalar_select %p133_p1, %s858_s20, %s135_s25  }
   0x9   : > { %p936_p5 = por %p146_p2, %p145_p0  ;;  %p940_p6 = por %p152_p4, %p151_p3 }
   0xa   : > { %p666_p7 = scmp.ge.s32.totalorder %s862_s21, 1  ;;  %p189_p8 = scmp.lt.s32.totalorder %s862_s21, 3 }
   0xc   : > { %p190_p9 = pnand %p666_p7, %p189_p8 }
   0xd   : > { %p216_p10 = scmp.lt.s32.totalorder (!%p190_p9), %s919_s22, 1  ;;  %s213_s14 = sand.u32 (!%p190_p9), 1, %s854_s19  }
   0xe   : > { %193 = sbr.rel (%p190_p9) target bundleno = 552 (0x228), region = 40  ;;  %s667_s15 = sshll.u32 (!%p190_p9), %s213_s14, 3 }
   0xf   : > { %s686_s16 = sshll.u32 (!%p190_p9), %s919_s22, 7  ;;  %s215_s17 = scalar_lea.vmem (!%p190_p9), [#allocation2], %s667_s15 }
  0x10   : > { %s604_s23 = sshll.u32 (!%p190_p9), %s215_s17, 4  ;;  %s602_s30 = scalar_lea.hbm (!%p190_p9), %s1094_s5, %s686_s16  ;;  %s605_s23 = int_to_ptr.vmem [resolvable:$true] %s604_s23 }
  0x11   : > { %s591_s6 = scalar_lea.sflag (!%p190_p9), [#allocation3], %s213_s14 }
  0x13   : > { %v790_v0 = vld [vmem:[%s1090_s1] sm:$0xff]   ;;  %vm374_vm0 = vcmask 64512   ;;  %s217_s7 = scalar_select %p216_p10, %s919_s22, 1  ;;  %vm399_vm1 = vcmask 1043456   ;;  %v864_v1 = vmov 0   ;;  %v791_v4 = vld [vmem:[%s1090_s1 + $0x8] sm:$0xff]  }
  0x14   : > { %709 = vmatprep.mubr.msk.bf16.mxu0 %vm374_vm0, %v790_v0  ;;  %788 = vset.pattern.permute.xlu0 %v864_v1  ;;  %v792_v5 = vld [vmem:[%s1090_s1 + $0x10] sm:$0xff]   ;;  %v250_v7 = vld [vmem:[%s1091_s2 + $0x60] sm:$0xff]  ;;  %v253_v8 = vld [vmem:[%s1091_s2 + $0x78] sm:$0xff]  ;;  %v865_v28 = vmov 0.0   ;;  %vm866_vm2 = vmmov 0  }
  0x15   : > { %s668_s8 = sshll.u32 %s217_s7, 2  ;;  %789 = vset.pattern.permute.xlu1 %v864_v1  ;;  %v252_v6 = vld [vmem:[%s1091_s2 + $0x70] sm:$0xff]  ;;  %v251_v9 = vld [vmem:[%s1091_s2 + $0x68] sm:$0xff]  ;;  %v793_v11 = vld [vmem:[%s1090_s1 + $0x18] sm:$0xff]   ;;  %725 = vmatprep.subr.bf16.mxu1 %v865_v28  ;;  %s802_s7 = scalar_lea.vmem %s605_s23, 128 }
  0x16   : > { %s219_s11 = scalar_lea.vmem %s1089_s0, %s668_s8  ;;  %326 = vperm.xlu0 %788, %v252_v6   ;;  %316 = vperm.xlu1 %789, %v250_v7   ;;  %v248_v10 = vld [vmem:[%s1091_s2 + $0x50] sm:$0xff]  ;;  %v249_v12 = vld [vmem:[%s1091_s2 + $0x58] sm:$0xff]  ;;  %v794_v13 = vld [vmem:[%s1090_s1 + $0x20] sm:$0xff]   ;;  %p803_p11 = scmp.ne.s32.totalorder %s605_s23, %s802_s7 }
  0x17   : > { %v237_v2 = vld [vmem:[%s219_s11] sm:$0xf]  ;;  %v247_v15 = vld [vmem:[%s1091_s2 + $0x48] sm:$0xff]  ;;  %v244_v16 = vld [vmem:[%s1091_s2 + $0x30] sm:$0xff]  ;;  %741 = vmatprep.mubr.msk.bf16.mxu1 %vm866_vm2, %v865_v28  ;;  %s867_s8 = smov [#allocation2]  }
  0x18   : > { %745 = vmatprep.subr.msk.bf16.mxu0 %vm399_vm1, %v237_v2  ;;  %v401_v3 = vsel %vm399_vm1, %v237_v2, 0  ;;  %v246_v14 = vld [vmem:[%s1091_s2 + $0x40] sm:$0xff]  ;;  %v795_v17 = vld [vmem:[%s1090_s1 + $0x28] sm:$0xff]   ;;  %v245_v18 = vld [vmem:[%s1091_s2 + $0x38] sm:$0xff]  ;;  %p804_p12 = pnand %p803_p11, %p936_p5  ;;  %s806_s9 = sshll.u32 %s867_s8, 4  ;;  %s807_s9 = int_to_ptr.vmem [resolvable:$false] %s806_s9 }
  0x19   : > { %708 = vmatpush3.bf16.msra.mxu0 %v401_v3  ;;  %v796_v19 = vld [vmem:[%s1090_s1 + $0x30] sm:$0xff]   ;;  %v242_v20 = vld [vmem:[%s1091_s2 + $0x20] sm:$0xff]  ;;  %v243_v21 = vld [vmem:[%s1091_s2 + $0x28] sm:$0xff]  ;;  %s808_s22 = scalar_lea.vmem %s807_s9, 256  ;;  %p809_p0 = scmp.lt.s32.totalorder %s605_s23, %s807_s9 }
  0x1a   : > { %331 = vperm.xlu0 %788, %v253_v8   ;;  %321 = vperm.xlu1 %789, %v251_v9   ;;  %v240_v22 = vld [vmem:[%s1091_s2 + $0x10] sm:$0xff]  ;;  %v797_v23 = vld [vmem:[%s1090_s1 + $0x38] sm:$0xff]   ;;  %v238_v25 = vld [vmem:[%s1091_s2] sm:$0xff]  ;;  %p805_p13 = pneg %p804_p12  ;;  %p810_p1 = scmp.lt.s32.totalorder %s808_s22, %s802_s7 }
  0x1b   : > { %v241_v24 = vld [vmem:[%s1091_s2 + $0x18] sm:$0xff]  ;;  %v239_v26 = vld [vmem:[%s1091_s2 + $0x8] sm:$0xff]  ;;  %v525_v27 = vld [vmem:[%s1093_s4] sm:$0xff] }
  0x1c   : > { %710 = vmatmul.mubr.msk.bf16.vlgmr.msra.gmra.mxu0 %vm374_vm0, %v791_v4  ;;  %p811_p2 = por %p810_p1, %p809_p0 }
  0x1d   : > { %713 = vmatprep.mubr.msk.bf16.mxu0 %vm374_vm0, %v792_v5 }
  0x1e   : > { %306 = vperm.xlu0 %788, %v248_v10   ;;  %311 = vperm.xlu1 %789, %v249_v12   ;;  %p812_p3 = pnand %p811_p2, %p805_p13 }
  0x22   : > { %296 = vperm.xlu0 %788, %v246_v14   ;;  %301 = vperm.xlu1 %789, %v247_v15  }
  0x24   : > { %714 = vmatmul.mubr.msk.bf16.gmra.mxu0 %vm374_vm0, %v793_v11 }
  0x25   : > { %717 = vmatprep.mubr.msk.bf16.mxu0 %vm374_vm0, %v794_v13 }
  0x26   : > { %286 = vperm.xlu0 %788, %v244_v16   ;;  %291 = vperm.xlu1 %789, %v245_v18  }
  0x2a   : > { %276 = vperm.xlu0 %788, %v242_v20   ;;  %281 = vperm.xlu1 %789, %v243_v21  }
  0x2c   : > { %718 = vmatmul.mubr.msk.bf16.gmra.mxu0 %vm374_vm0, %v795_v17 }
  0x2d   : > { %721 = vmatprep.mubr.msk.bf16.mxu0 %vm374_vm0, %v796_v19 }
  0x2e   : > { %266 = vperm.xlu0 %788, %v240_v22   ;;  %271 = vperm.xlu1 %789, %v241_v24  }
  0x32   : > { %256 = vperm.xlu0 %788, %v238_v25   ;;  %261 = vperm.xlu1 %789, %v239_v26  }
  0x34   : > { %722 = vmatmul.mubr.msk.bf16.gmra.mxu0 %vm374_vm0, %v797_v23 }
  0x36   : > { %528 = vperm.xlu0 %788, %v525_v27  }
  0x91   : > { %v317_v33 = vpop.permute.xlu1 %316  ;;  %v327_v35 = vpop.permute.xlu0 %326 }
  0x95   : > { %v322_v38 = vpop.permute.xlu1 %321  ;;  %v332_v40 = vpop.permute.xlu0 %331 }
  0x99   : > { %v312_v43 = vpop.permute.xlu1 %311  ;;  %v307_v45 = vpop.permute.xlu0 %306 }
  0x9d   : > { %v302_v48 = vpop.permute.xlu1 %301  ;;  %v297_v51 = vpop.permute.xlu0 %296 }
  0xa1   : > { %v292_v59 = vpop.permute.xlu1 %291  ;;  %v287_v63 = vpop.permute.xlu0 %286 }
  0xa5   : > { %v282_v5 = vpop.permute.xlu1 %281  ;;  %v277_v8 = vpop.permute.xlu0 %276 }
  0xa9   : > { %v272_v14 = vpop.permute.xlu1 %271  ;;  %v267_v18 = vpop.permute.xlu0 %266 }
  0xad   : > { %v262_v24 = vpop.permute.xlu1 %261  ;;  %v257_v27 = vpop.permute.xlu0 %256 }
  0xdc   : > { %v1036_v29 = vpop.f32.mrf.mxu0 }
  0xdd   : > { %v446_v25 = vadd.f32 %v1036_v29, %v267_v18 }
  0xde   : > { %v1038_v30 = vpop.f32.mrf.mxu0 }
  0xe0   : > { %v712_v31 = vpop.f32.mrf.mxu0 }
  0xe1   : > { %v449_v21 = vadd.f32 %v712_v31, %v272_v14 }
  0xe2   : > { %v1040_v32 = vpop.f32.mrf.mxu0 }
  0xe4   : > { %v715_v34 = vpop.f32.mrf.mxu0 }
  0xe5   : > { %v462_v12 = vadd.f32 %v715_v34, %v287_v63  ;;  %v441_v34 = vadd.f32 %v1040_v32, %v262_v24  ;;  %v529_v32 = vpop.permute.xlu0 %528 }
  0xe6   : > { %v453_v36 = vpop.f32.mrf.mxu0 }
  0xe7   : > { %v506_v19 = vmax.f32 %v462_v12, 0.0  ;;  %v454_v20 = vadd.f32 %v453_v36, %v277_v8  ;;  %v438_v36 = vadd.f32 %v1038_v30, %v257_v27 }
  0xe8   : > { %v716_v37 = vpop.f32.mrf.mxu0 }
  0xe9   : > { %v465_v9 = vadd.f32 %v716_v37, %v292_v59  ;;  %v504_v26 = vmax.f32 %v454_v20, 0.0  ;;  %v502_v37 = vmax.f32 %v446_v25, 0.0 }
  0xea   : > { %v456_v39 = vpop.f32.mrf.mxu0 }
  0xeb   : > { %v507_v15 = vmax.f32 %v465_v9, 0.0  ;;  %v457_v16 = vadd.f32 %v456_v39, %v282_v5  ;;  %v500_v39 = vmax.f32 %v438_v36, 0.0 }
  0xec   : > { %v719_v41 = vpop.f32.mrf.mxu0 }
  0xed   : > { %v478_v0 = vadd.f32 %v719_v41, %v307_v45  ;;  %v520_v22 = vpack.c.bf16 %v507_v15, %v506_v19  ;;  %v505_v23 = vmax.f32 %v457_v16, 0.0 }
  0xee   : > { %v469_v42 = vpop.f32.mrf.mxu0 }
  0xef   : > { %v510_v6 = vmax.f32 %v478_v0, 0.0  ;;  %v470_v7 = vadd.f32 %v469_v42, %v297_v51 }
  0xf0   : > { %v720_v44 = vpop.f32.mrf.mxu0 }
  0xf1   : > { %v481_v60 = vadd.f32 %v720_v44, %v312_v43  ;;  %v508_v13 = vmax.f32 %v470_v7, 0.0 }
  0xf2   : > { %v472_v46 = vpop.f32.mrf.mxu0 }
  0xf3   : > { %v511_v2 = vmax.f32 %v481_v60, 0.0  ;;  %v473_v3 = vadd.f32 %v472_v46, %v302_v48 }
  0xf4   : > { %v723_v47 = vpop.f32.mrf.mxu0 }
  0xf5   : > { %v494_v50 = vadd.f32 %v723_v47, %v327_v35  ;;  %v522_v10 = vpack.c.bf16 %v511_v2, %v510_v6  ;;  %v509_v11 = vmax.f32 %v473_v3, 0.0  ;;  %v519_v35 = vpack.c.bf16 %v505_v23, %v504_v26 }
  0xf6   : > { %v485_v49 = vpop.f32.mrf.mxu0 }
  0xf7   : > { %v514_v55 = vmax.f32 %v494_v50, 0.0  ;;  %v486_v56 = vadd.f32 %v485_v49, %v317_v33  ;;  %v521_v17 = vpack.c.bf16 %v509_v11, %v508_v13  ;;  %v503_v33 = vmax.f32 %v449_v21, 0.0 }
  0xf8   : > { %v724_v52 = vpop.f32.mrf.mxu0 }
  0xf9   : > { %v497_v53 = vadd.f32 %v724_v52, %v332_v40  ;;  %v512_v1 = vmax.f32 %v486_v56, 0.0  ;;  %v518_v31 = vpack.c.bf16 %v503_v33, %v502_v37  ;;  %v516_v40 = vld [vmem:[%s1092_s3] sm:$0xf] }
  0xfa   : > { %v488_v54 = vpop.f32.mrf.mxu0 }
  0xfb   : > { %v515_v57 = vmax.f32 %v497_v53, 0.0  ;;  %v489_v58 = vadd.f32 %v488_v54, %v322_v38  ;;  %v501_v38 = vmax.f32 %v441_v34, 0.0 }
  0xfd   : > { %v513_v61 = vmax.f32 %v489_v58, 0.0  ;;  %v524_v62 = vpack.c.bf16 %v515_v57, %v514_v55  ;;  %v517_v29 = vpack.c.bf16 %v501_v38, %v500_v39 }
  0xff   : > { %726 = vmatpush3.bf16.msra.mxu1 %v524_v62  ;;  %v523_v4 = vpack.c.bf16 %v513_v61, %v512_v1 }
 0x100   : > { %727 = vmatprep.subr.bf16.mxu1 %v865_v28 }
 0x103   : > { %728 = vmatpush3.bf16.msra.mxu1 %v523_v4 }
 0x104   : > { %729 = vmatprep.subr.bf16.mxu1 %v865_v28 }
 0x107   : > { %730 = vmatpush3.bf16.msra.mxu1 %v522_v10 }
 0x108   : > { %731 = vmatprep.subr.bf16.mxu1 %v865_v28 }
 0x10b   : > { %732 = vmatpush3.bf16.msra.mxu1 %v521_v17 }
 0x10c   : > { %733 = vmatprep.subr.bf16.mxu1 %v865_v28 }
 0x10f   : > { %734 = vmatpush3.bf16.msra.mxu1 %v520_v22 }
 0x110   : > { %735 = vmatprep.subr.bf16.mxu1 %v865_v28 }
 0x113   : > { %736 = vmatpush3.bf16.msra.mxu1 %v519_v35 }
 0x114   : > { %737 = vmatprep.subr.bf16.mxu1 %v865_v28 }
 0x117   : > { %738 = vmatpush3.bf16.msra.mxu1 %v518_v31 }
 0x118   : > { %739 = vmatprep.subr.bf16.mxu1 %v865_v28 }
 0x11b   : > { %740 = vmatpush3.bf16.msra.mxu1 %v517_v29 }
 0x11e   : > { %742 = vmatmul.mubr.bf16.vlgmr.msra.gmra.mxu1 %v516_v40 }
 0x1de   : > { %v565_v41 = vpop.f32.mrf.mxu1 }
 0x1df   : > { %v566_v42 = vadd.f32 %v565_v41, %v529_v32 }
 0x1e0   : > { %v743_v30 = vpop.f32.mrf.mxu1 }
 0x1e1   : > { %v571_v43 = vrot.slane %v566_v42, 4 }
 0x1e2   : > { %v568_v44 = vpop.f32.mrf.mxu1 }
 0x1e3   : > { %v572_v45 = vmax.f32 %v566_v42, %v571_v43 }
 0x1e4   : > { %v744_v46 = vpop.f32.mrf.mxu1 }
 0x1e5   : > { %v573_v47 = vrot.slane %v572_v45, 2 }
 0x1e7   : > { %v574_v48 = vmax.f32 %v572_v45, %v573_v47 }
 0x1e9   : > { %v575_v28 = vrot.slane %v574_v48, 1 }
 0x1eb   : > { %v576_v49 = vmax.f32 %v574_v48, %v575_v28 }
 0x1ed   : > { %v577_v50 = vsub.f32 %v566_v42, %v576_v49 }
 0x1ef   : > { %v578_v51 = vmul.f32 1.442695, %v577_v50 }
 0x1f1   : > { %798 = vpow2.f32 %v578_v51 }
 0x1fe   : > { %v799_v52 = vpop.eup %798 }
 0x1ff   : > { %v580_v53 = vrot.slane %v799_v52, 4 }
 0x201   : > { %v581_v54 = vadd.f32 %v799_v52, %v580_v53 }
 0x203   : > { %v582_v55 = vrot.slane %v581_v54, 2 }
 0x205   : > { %v583_v56 = vadd.f32 %v582_v55, %v581_v54 }
 0x207   : > { %v584_v57 = vrot.slane %v583_v56, 1 }
 0x209   : > { %v585_v58 = vadd.f32 %v584_v57, %v583_v56 }
 0x20b   : > { %800 = vrcp.f32 %v585_v58 }
 0x218   : > { %v801_v59 = vpop.eup %800 }
 0x219   : > { %v588_v60 = vmul.f32 %v801_v59, %v799_v52 }
 0x21b   : > { %589 = vst [vmem:[%s215_s17] sm:$0xff] %v588_v60 }
 0x21c   : > { %815 = shalt.err (!%p812_p3)
}
 0x21d   : > { %s816_s10 = scalar_lea.hbm %s602_s30, 128  ;;  %s820_s13 = scalar_lea.hbm %s1094_s5, 256 }
 0x21e   : > { %p817_p4 = scmp.ne.s32.totalorder %s602_s30, %s816_s10  ;;  %p821_p9 = scmp.lt.s32.totalorder %s602_s30, %s1094_s5 }
 0x21f   : > { %p822_p10 = scmp.lt.s32.totalorder %s820_s13, %s816_s10 }
 0x220   : > { %p818_p7 = pnand %p817_p4, %p936_p5 }
 0x221   : > { %p823_p11 = por %p822_p10, %p821_p9 }
 0x222   : > { %p819_p8 = pneg %p818_p7 }
 0x224   : > { %p824_p12 = pnand %p823_p11, %p819_p8 }
 0x226   : > { %827 = shalt.err (!%p824_p12)
}
 0x227   : > { %746 = dma.vmem_to_hbm [thread:$0]  (%p936_p5), %s605_s23, 128, %s602_s30, %s591_s6  }
 0x228 PF: > { %p752_p13 = scmp.ge.s32.totalorder %s862_s21, 2  ;;  %s616_s16 = sand.u32 1, %s850_s18  }
 0x229   : > { %s617_s17 = scalar_lea.sflag [#allocation3], %s616_s16 }
 0x22a   : > { %p749_p0 = pnand %p752_p13, %p940_p6 }
 0x22c   : > { %p750_p1 = pneg %p749_p0 }
 0x22e   : > { %845 = dma.done.wait (%p750_p1), %s617_s17, 128  }
 0x22f   : > { %847 = vsyncadd (%p750_p1), %s617_s17, 4294967168  ;;  %p15_p2 = scmp.ge.s32.totalorder %s923_s24, 4   ;;  %s1097_s18 = smov %s854_s19 }
 0x230   : > { %s1098_s19 = smov %s858_s20  ;;  %s1099_s20 = smov %s934_s27 }
 0x231   : > { %s1100_s21 = smov %s923_s24  ;;  %17 = sbr.rel (!%p15_p2) target bundleno = 3 (0x3), region = 75 }
 0x236   :  { %622 = vsyncpa [#allocation3], 1 }
 0x237   :  { %624 = vsyncpa [#allocation3 + $0x1], 1 }

</bundles_post_ra>
